<compile_context>
chip_gen: v7x
topology: tpu7x:2x2x1
jax: 0.10.0
libtpu: 0.0.40
codegen_flags: <defaults>
</compile_context>

<pallas_src>
import jax
import jax.numpy as jnp
from jax.experimental import pallas as pl
from jax.experimental.pallas import tpu as pltpu

LANE = 128


def _round_up(x, m):
    return ((x + m - 1) // m) * m


def _tpu_vmem_and_cores():
    """(per-TensorCore VMEM bytes, #TensorCores per chip) with safe fallbacks."""
    try:
        cap = int(pltpu.get_tpu_info().vmem_capacity_bytes)
    except Exception:  # interpret mode / older jax: assume 128 MiB-class chip
        cap = 128 * 1024 * 1024
    # 64 MiB-per-TC chips (v7x class) have 2 TensorCores per chip.
    num_tc = 2 if cap <= 64 * 1024 * 1024 else 1
    return cap, num_tc


def _vmem_budget_bytes(cap):
    # 64 MiB on 128 MiB-class chips (v5e/v6e); cap//2 = 32 MiB on v7x.
    return min(cap // 2, 64 * 1024 * 1024)


def _choose_tm(n_rows, hid, o_pad, x_bytes, w_bytes, out_bytes, budget, num_tc):
    """Largest bf16-friendly (multiple-of-16) row tile whose double-buffered
    working set fits the scoped VMEM budget, capped so 2-TC chips get >= 2
    grid steps."""
    n16 = max(_round_up(n_rows, 16), 16)
    # Weight + bias are logically resident (constant index_map) but Pallas
    # still allocates buffer_count (=2) copies of every input block.
    resident = 2 * (hid * o_pad * w_bytes + o_pad * 4)
    tm = 16
    for cand in (8192, 4096, 2048, 1024, 512, 256, 128, 64, 32, 16):
        c = min(cand, n16)
        working = 2 * c * hid * x_bytes + 2 * c * o_pad * out_bytes + resident
        if working <= budget:
            tm = c
            break
    # Keep the grid >= 2 steps on 2-TensorCore chips so "parallel" sharding
    # can use both cores (no-op on single-TC v5e/v6e).
    if num_tc > 1 and n_rows > 16:
        tm_two_steps = max(_round_up(pl.cdiv(n_rows, 2), 16), 16)
        if pl.cdiv(n_rows, tm_two_steps) >= 2:
            tm = min(tm, tm_two_steps)
    return tm


def prepare_logreg_params(weight, bias, compute_dtype=jnp.bfloat16):
    """One-time parameter prep: transpose to (H, O), pad O to a lane multiple,
    cast to the compute dtype.  Padded columns are zero so they do not perturb
    the valid outputs (padded output columns are exactly 0)."""
    out_dim, hid_dim = weight.shape
    o_pad = _round_up(out_dim, LANE)
    wt = jnp.zeros((hid_dim, o_pad), compute_dtype)
    wt = wt.at[:, :out_dim].set(weight.T.astype(compute_dtype))
    b = jnp.zeros((1, o_pad), jnp.float32)
    b = b.at[:, :out_dim].set(bias.astype(jnp.float32)[None, :])
    return wt, b, out_dim


def logreg_kernel(x_ref, wt_ref, b_ref, o_ref):
    # Cast x to the compute dtype in-kernel (spare VPU slots), one MXU matmul
    # per row-tile with f32 accumulation, broadcast bias add in f32.
    x = x_ref[...].astype(wt_ref.dtype)
    acc = jnp.dot(x, wt_ref[...], preferred_element_type=jnp.float32)
    o_ref[...] = (acc + b_ref[...]).astype(o_ref.dtype)


@jax.jit
def logreg_apply(x, wt, b):
    """x: (N, hid) in its native dtype, wt: (hid, O_pad) bf16, b: (1, O_pad) f32.
    Returns the lane-padded (N, O_pad) f32 logits (padded columns are zero)."""
    n, hid = x.shape
    o_pad = wt.shape[1]

    x_bytes = jnp.dtype(x.dtype).itemsize
    w_bytes = jnp.dtype(wt.dtype).itemsize
    out_bytes = 4

    cap, num_tc = _tpu_vmem_and_cores()
    budget = _vmem_budget_bytes(cap)
    tm = _choose_tm(n, hid, o_pad, x_bytes, w_bytes, out_bytes, budget, num_tc)

    grid = (pl.cdiv(n, tm),)
    n_eff = grid[0] * tm  # rows processed including the masked tail

    cost = pl.CostEstimate(
        flops=2 * n_eff * hid * o_pad,
        transcendentals=0,
        bytes_accessed=(x_bytes * n * hid          # x (read once, native dtype)
                        + w_bytes * hid * o_pad    # weight (VMEM-resident)
                        + 4 * o_pad                # bias
                        + out_bytes * n * o_pad),  # output
    )

    return pl.pallas_call(
        logreg_kernel,
        out_shape=jax.ShapeDtypeStruct((n, o_pad), jnp.float32),
        grid_spec=pltpu.PrefetchScalarGridSpec(
            num_scalar_prefetch=0,
            grid=grid,
            in_specs=[
                pl.BlockSpec((tm, hid), lambda i: (i, 0)),     # x row-tile (pipelined)
                pl.BlockSpec((hid, o_pad), lambda i: (0, 0)),  # weight (resident)
                pl.BlockSpec((1, o_pad), lambda i: (0, 0)),    # bias   (resident)
            ],
            out_specs=pl.BlockSpec((tm, o_pad), lambda i: (i, 0)),
        ),
        compiler_params=pltpu.CompilerParams(
            dimension_semantics=("parallel",),
            vmem_limit_bytes=budget,
        ),
        cost_estimate=cost,
    )(x, wt, b)


def logreg_forward(x, weight, bias):
    """Convenience wrapper matching the PyTorch LogReg.forward signature.
    For repeated calls, call prepare_logreg_params once and logreg_apply per
    step; consumers that can ignore the padded (zero) columns should use the
    padded output directly to avoid a relayout copy from the narrow slice."""
    wt, b, out_dim = prepare_logreg_params(weight, bias)
    out = logreg_apply(x, wt, b)
    return out[:, :out_dim]


if __name__ == "__main__":
    # Small shapes consistent with LogReg(hid_dim, out_dim)
    N, hid_dim, out_dim = 8, 32, 16

    key = jax.random.PRNGKey(0)
    kx, kw, kb = jax.random.split(key, 3)

    x = jax.random.normal(kx, (N, hid_dim), dtype=jnp.float32)

    # Deterministic param init mimicking nn.Linear default: U(-1/sqrt(hid), 1/sqrt(hid))
    bound = 1.0 / (hid_dim ** 0.5)
    weight = jax.random.uniform(kw, (out_dim, hid_dim), minval=-bound, maxval=bound,
                                dtype=jnp.float32)
    bias = jax.random.uniform(kb, (out_dim,), minval=-bound, maxval=bound,
                              dtype=jnp.float32)

    out = logreg_forward(x, weight, bias)
    out = jax.block_until_ready(out)

    # Correctness check against plain-JAX f32 reference (kernel uses bf16 weights
    # and in-kernel bf16 cast of x with f32 accumulation -> bf16-level tolerance).
    ref = x @ weight.T + bias
    assert out.shape == (N, out_dim)
    assert jnp.allclose(out, ref, atol=5e-2, rtol=5e-2), (
        f"max abs err {jnp.max(jnp.abs(out - ref))}")

    print("KERNEL_OK")
</pallas_src>

<mosaic_0001>
module attributes {stable_mosaic.version = 11 : i64} {
  func.func @logreg_kernel(%arg0: i32, %arg1: memref<16x32xf32, #tpu.memory_space<vmem>>, %arg2: memref<32x128xbf16, #tpu.memory_space<vmem>>, %arg3: memref<1x128xf32, #tpu.memory_space<vmem>>, %arg4: memref<16x128xf32, #tpu.memory_space<vmem>>) attributes {dimension_semantics = [#tpu.dimension_semantics<parallel>], iteration_bounds = array<i64: 1>, scalar_prefetch = 0 : i64, scratch_operands = 0 : i64, tpu.core_type = #tpu.core_type<tc>, window_params = [{transform_indices = @transform_0, window_bounds = array<i64: 16, 32>}, {pipeline_mode = #tpu.pipeline_mode<synchronous>, transform_indices = @transform_1, window_bounds = array<i64: 32, 128>}, {pipeline_mode = #tpu.pipeline_mode<synchronous>, transform_indices = @transform_2, window_bounds = array<i64: 1, 128>}, {transform_indices = @transform_3, window_bounds = array<i64: 16, 128>}]} {
    %c0 = arith.constant 0 : index
    %c0_0 = arith.constant 0 : index
    %0 = vector.load %arg1[%c0, %c0_0] : memref<16x32xf32, #tpu.memory_space<vmem>>, vector<16x32xf32>
    %1 = arith.truncf %0 : vector<16x32xf32> to vector<16x32xbf16>
    %c0_1 = arith.constant 0 : index
    %c0_2 = arith.constant 0 : index
    %2 = vector.load %arg2[%c0_1, %c0_2] : memref<32x128xbf16, #tpu.memory_space<vmem>>, vector<32x128xbf16>
    %cst = arith.constant dense<0.000000e+00> : vector<16x128xf32>
    %3 = tpu.matmul %1, %2, %cst {dimension_numbers = #tpu.dot_dimension_numbers<[1], [0], [0], [1], [0, 0, 1, 1], [], []>} : vector<16x32xbf16>, vector<32x128xbf16>, vector<16x128xf32> -> vector<16x128xf32>
    %c0_3 = arith.constant 0 : index
    %c0_4 = arith.constant 0 : index
    %4 = vector.load %arg3[%c0_3, %c0_4] : memref<1x128xf32, #tpu.memory_space<vmem>>, vector<1x128xf32>
    %5 = vector.broadcast %4 : vector<1x128xf32> to vector<16x128xf32>
    %6 = arith.addf %3, %5 : vector<16x128xf32>
    %c0_5 = arith.constant 0 : index
    %c0_6 = arith.constant 0 : index
    %7 = vector.load %arg4[%c0_5, %c0_6] : memref<16x128xf32, #tpu.memory_space<vmem>>, vector<16x128xf32>
    tpu.vector_store %arg4[%c0_5, %c0_6], %6 {strides = array<i32>} : memref<16x128xf32, #tpu.memory_space<vmem>>, vector<16x128xf32>,
    return
  }
  func.func @transform_0(%arg0: i32) -> (i32, i32) {
    %c0_i32 = arith.constant 0 : i32
    %c0_i32_0 = arith.constant 0 : i32
    return %arg0, %c0_i32 : i32, i32
  }
  func.func @transform_1(%arg0: i32) -> (i32, i32) {
    %c0_i32 = arith.constant 0 : i32
    %c0_i32_0 = arith.constant 0 : i32
    %c0_i32_1 = arith.constant 0 : i32
    return %c0_i32, %c0_i32_0 : i32, i32
  }
  func.func @transform_2(%arg0: i32) -> (i32, i32) {
    %c0_i32 = arith.constant 0 : i32
    %c0_i32_0 = arith.constant 0 : i32
    %c0_i32_1 = arith.constant 0 : i32
    return %c0_i32, %c0_i32_0 : i32, i32
  }
  func.func @transform_3(%arg0: i32) -> (i32, i32) {
    %c0_i32 = arith.constant 0 : i32
    %c0_i32_0 = arith.constant 0 : i32
    return %arg0, %c0_i32 : i32, i32
  }
}

</mosaic_0001>

<bundles_post_ra>
// kernel: logreg_apply.1
= control target key start
LH: loop header
LB: loop body
LE: loop exit
PB: predicated region body
PF: predicated region fallthrough
CT: control target
= control target key end

     0   :  { %8 = vsyncpa [#allocation3], 0  ;;  %s351_s0 = inlined_call_operand.hbm [shape: f32[8,32], index: 0, kind: input, shape index: {}]   ;;  %s352_s1 = inlined_call_operand.hbm [shape: bf16[32,128], index: 1, kind: input, shape index: {}]   ;;  %s353_s2 = inlined_call_operand.hbm [shape: f32[1,128], index: 2, kind: input, shape index: {}]   ;;  %s354_s3 = inlined_call_operand.hbm [shape: f32[8,128], index: 3, kind: output, shape index: {}]  }
   0x1   :  { %9 = vsyncpa [#allocation6], 0 }
   0x2   :  { %10 = vsyncpa [#allocation4], 0 }
   0x3   :  { %15 = vsyncadd [#allocation3], 128  ;;  %s267_s12 = smov [#allocation5]   ;;  %s173_s16 = scalar_lea.hbm %s352_s1, 256 }
   0x4   :  { %s28_s13 = sshll.u32 %s267_s12, 4  ;;  %p174_p0 = scmp.ne.s32.totalorder %s352_s1, %s173_s16  ;;  %s29_s13 = int_to_ptr.vmem [resolvable:$true] %s28_s13 }
   0x5   :  { %p177_p1 = scmp.lt.u32.totalorder %s173_s16, %s352_s1 }
   0x7   :  { %p179_p2 = pnand %p177_p1, %p174_p0 }
   0x9   :  { %182 = shalt.err (!%p179_p2)
}
   0xa   :  { %s183_s21 = scalar_lea.vmem %s29_s13, 256  ;;  %p188_p4 = scmp.lt.s32.totalorder %s29_s13, %s29_s13 }
   0xb   :  { %p184_p3 = scmp.ne.s32.totalorder %s29_s13, %s183_s21  ;;  %p189_p5 = scmp.lt.s32.totalorder %s183_s21, %s183_s21 }
   0xd   :  { %p190_p6 = por %p189_p5, %p188_p4 }
   0xf   :  { %p191_p7 = pnand %p190_p6, %p184_p3 }
  0x11   :  { %194 = shalt.err (!%p191_p7)
}
  0x12   :  { %s268_s22 = smov 64   ;;  %s269_s23 = smov 4  }
  0x13   :  { %34 = dma.hbm_to_vmem [thread:$0]  %s352_s1, 256, %s29_s13, [#allocation6], %s268_s22, %s268_s22, %s269_s23  }
  0x14   :  { %s270_s26 = smov [#allocation2]   ;;  %s195_s30 = scalar_lea.hbm %s351_s0, 128 }
  0x15   :  { %s16_s27 = sshll.u32 %s270_s26, 4  ;;  %p196_p8 = scmp.ne.s32.totalorder %s351_s0, %s195_s30  ;;  %s17_s27 = int_to_ptr.vmem [resolvable:$true] %s16_s27 }
  0x16   :  { %p199_p9 = scmp.lt.u32.totalorder %s195_s30, %s351_s0 }
  0x18   :  { %p201_p10 = pnand %p199_p9, %p196_p8 }
  0x1a   :  { %204 = shalt.err (!%p201_p10)
}
  0x1b   :  { %s205_s8 = scalar_lea.vmem %s17_s27, 128  ;;  %s209_s1 = scalar_lea.vmem %s17_s27, 256 }
  0x1c   :  { %p206_p11 = scmp.ne.s32.totalorder %s17_s27, %s205_s8  ;;  %p210_p12 = scmp.lt.s32.totalorder %s17_s27, %s17_s27 }
  0x1d   :  { %p211_p13 = scmp.lt.s32.totalorder %s209_s1, %s205_s8 }
  0x1f   :  { %p212_p0 = por %p211_p13, %p210_p12 }
  0x21   :  { %p213_p1 = pnand %p212_p0, %p206_p11 }
  0x23   :  { %216 = shalt.err (!%p213_p1)
}
  0x24   :  { %s271_s9 = smov 128   ;;  %s272_s10 = smov 8  }
  0x25   :  { %22 = dma.hbm_to_vmem [thread:$0]  %s351_s0, 128, %s17_s27, [#allocation3], %s271_s9, %s271_s9, %s272_s10  }
  0x26   :  { %s273_s13 = smov [#allocation7]   ;;  %s217_s17 = scalar_lea.hbm %s353_s2, 16 }
  0x27   :  { %s41_s14 = sshll.u32 %s273_s13, 4  ;;  %p218_p2 = scmp.ne.s32.totalorder %s353_s2, %s217_s17  ;;  %s42_s14 = int_to_ptr.vmem [resolvable:$true] %s41_s14 }
  0x28   :  { %p221_p3 = scmp.lt.u32.totalorder %s217_s17, %s353_s2 }
  0x2a   :  { %p223_p4 = pnand %p221_p3, %p218_p2 }
  0x2c   :  { %226 = shalt.err (!%p223_p4)
}
  0x2d   :  { %s227_s22 = scalar_lea.vmem %s42_s14, 16  ;;  %s231_s0 = scalar_lea.vmem %s42_s14, 32 }
  0x2e   :  { %p228_p5 = scmp.ne.s32.totalorder %s42_s14, %s227_s22  ;;  %p232_p6 = scmp.lt.s32.totalorder %s42_s14, %s42_s14 }
  0x2f   :  { %p233_p7 = scmp.lt.s32.totalorder %s231_s0, %s227_s22 }
  0x31   :  { %p234_p8 = por %p233_p7, %p232_p6 }
  0x33   :  { %p235_p9 = pnand %p234_p8, %p228_p5 }
  0x35   :  { %238 = shalt.err (!%p235_p9)
}
  0x36   :  { %44 = dma.hbm_to_vmem [thread:$0]  %s353_s2, 16, %s42_s14, [#allocation6]  }
  0x37   :  { %261 = dma.done.wait [#allocation3], 256  }
  0x38   :  { %262 = vsyncadd [#allocation3], 4294967040 }
  0x39   :  { %263 = dma.done.wait [#allocation6], 272  }
  0x3a   :  { %264 = vsyncadd [#allocation6], 4294967024  ;;  %v274_v0 = vmov 0.0   ;;  %vm275_vm0 = vmmov 0   ;;  %v171_v1 = vld [vmem:[#allocation5] sm:$0xff]   ;;  %v172_v2 = vld [vmem:[#allocation5 + $0x8] sm:$0xff]  }
  0x3b   :  { %153 = vmatprep.subr.bf16.mxu0 %v274_v0  ;;  %157 = vmatprep.mubr.msk.bf16.mxu0 %vm275_vm0, %v274_v0  ;;  %v55_v3 = vld [vmem:[#allocation2] sm:$0xff]  ;;  %v56_v4 = vld [vmem:[#allocation2 + $0x8] sm:$0xff]  ;;  %vm81_vm1 = vcmask 261120  }
  0x3c   :  { %154 = vmatpush3.bf16.msra.mxu0 %v171_v1  ;;  %v57_v5 = vpack.c.bf16 %v56_v4, %v55_v3  ;;  %v146_v6 = vld [vmem:[#allocation7] ss:$0 sm:$0xff] }
  0x3d   :  { %155 = vmatprep.subr.bf16.mxu0 %v274_v0 }
  0x40   :  { %156 = vmatpush3.bf16.msra.mxu0 %v172_v2 }
  0x43   :  { %158 = vmatmul.mubr.msk.bf16.vlgmr.msra.gmra.mrb[0].mxu0 %vm81_vm1, %v57_v5 }
 0x116   :  { %v119_v7 = vpop.f32.mrb[0].mxu0 }
 0x117   :  { %v120_v8 = vadd.f32 %v146_v6, %v119_v7  ;;  %v159_v9 = vpop.f32.mrb[1].mxu0 }
 0x118   :  { %v122_v10 = vpop.f32.mrb[2].mxu0 }
 0x119   :  { %126 = vst [vmem:[#allocation8] sm:$0xff] %v120_v8  ;;  %v123_v11 = vadd.f32 %v146_v6, %v122_v10  ;;  %v160_v12 = vpop.f32.mrb[3].mxu0 }
 0x11b   :  { %127 = vst [vmem:[#allocation8 + $0x8] sm:$0xff] %v123_v11 }
 0x11c   :  { %132 = vsyncadd [#allocation4], 128  ;;  %s276_s2 = smov [#allocation8]  }
 0x11d   :  { %s133_s25 = sshll.u32 %s276_s2, 4  ;;  %s134_s25 = int_to_ptr.vmem [resolvable:$true] %s133_s25 }
 0x11e   :  { %s239_s26 = scalar_lea.vmem %s134_s25, 128  ;;  %s243_s27 = scalar_lea.vmem %s134_s25, 256 }
 0x11f   :  { %p240_p10 = scmp.ne.s32.totalorder %s134_s25, %s239_s26  ;;  %p244_p11 = scmp.lt.s32.totalorder %s134_s25, %s134_s25 }
 0x120   :  { %p245_p12 = scmp.lt.s32.totalorder %s243_s27, %s239_s26 }
 0x122   :  { %p246_p13 = por %p245_p12, %p244_p11 }
 0x124   :  { %p247_p0 = pnand %p246_p13, %p240_p10 }
 0x126   :  { %250 = shalt.err (!%p247_p0)
}
 0x127   :  { %s251_s30 = scalar_lea.hbm %s354_s3, 128 }
 0x128   :  { %p252_p1 = scmp.ne.s32.totalorder %s354_s3, %s251_s30  ;;  %p255_p2 = scmp.lt.u32.totalorder %s251_s30, %s354_s3 }
 0x12a   :  { %p257_p3 = pnand %p255_p2, %p252_p1 }
 0x12c   :  { %260 = shalt.err (!%p257_p3)
}
 0x12d   :  { %139 = dma.vmem_to_hbm [thread:$0]  %s134_s25, 128, %s354_s3, [#allocation4], %s271_s9, %s271_s9, %s272_s10  }
 0x12e   :  { %265 = dma.done.wait [#allocation4], 256  }
 0x12f   :  { %266 = vsyncadd [#allocation4], 4294967040 }
 0x130   :  { %143 = vsyncpa [#allocation3], 1 }
 0x131   :  { %144 = vsyncpa [#allocation6], 1 }
 0x132   :  { %145 = vsyncpa [#allocation4], 1 }

</bundles_post_ra>
